<compile_context>
chip_gen: v7x
topology: tpu7x:2x2x1
jax: 0.10.0
libtpu: 0.0.40
codegen_flags: <defaults>
</compile_context>

<pallas_src>
import functools

import numpy as np
import jax
import jax.numpy as jnp
from jax.experimental import pallas as pl
from jax.experimental.pallas import tpu as pltpu


def _inst_inst_clr_kernel(anchor_ref, posn_ref, out_ref, *, inv_temp, exp_bf16):
    tb = anchor_ref.shape[0]

    # --- L2-normalize the anchor tile (f32 math, F.normalize eps=1e-12) with
    # --- 1/T folded into the per-row scale (a (TB,1)-sized multiply).
    a32 = anchor_ref[...].astype(jnp.float32)                        # (TB, D)
    inv_norm = jax.lax.rsqrt(
        jnp.maximum(jnp.sum(a32 * a32, axis=-1, keepdims=True), 1e-24))
    a32 = a32 * (inv_norm * inv_temp)

    # pos arrives pre-normalized from the wrapper (f32, or bf16 on fast path).
    p = posn_ref[...]                                                 # (B, D)

    # --- logits straight off the MXU (temperature already folded into a) -----
    logits = jax.lax.dot_general(
        a32.astype(p.dtype), p,
        dimension_numbers=(((1,), (1,)), ((), ())),
        preferred_element_type=jnp.float32)                           # (TB, B)

    # --- positive logit = <a_i, p_i>/T via a per-row (TB,D) dot against the
    # --- matching pos rows (no (TB,B) iota/where/cross-lane reduce), in f32.
    row0 = pl.multiple_of(pl.program_id(0) * tb, 8)
    p_diag = posn_ref[pl.ds(row0, tb), :].astype(jnp.float32)         # (TB, D)
    pos_logit = jnp.sum(a32 * p_diag, axis=-1, keepdims=True)         # (TB, 1)

    # --- cross entropy with label 0: lse(logits) - positive -------------------
    m = jnp.max(logits, axis=-1, keepdims=True)
    z = logits - m
    if exp_bf16:
        # bf16 EUP path (v6e/v7x only): z <= 0 after max-subtraction so the
        # exp error is small; accumulate the sum in f32.
        e = jnp.exp(z.astype(jnp.bfloat16)).astype(jnp.float32)
    else:
        e = jnp.exp(z)
    lse = m + jnp.log(jnp.sum(e, axis=-1, keepdims=True))
    out_ref[...] = lse - pos_logit                                    # (TB, 1)


def _pick_block_rows(B, requested=None):
    """Row-tile size: multiple of 8 dividing B (or B itself), ~256 target,
    >= 2 grid steps when possible so both v7x TensorCores get work."""
    def legal(br):
        return br == B or (br % 8 == 0 and B % br == 0)
    if requested is not None and legal(requested):
        return requested
    cands = [br for br in range(8, min(B, 512) + 1, 8) if B % br == 0]
    if not cands:
        return B                                  # irregular B: single full tile
    multi = [br for br in cands if br * 2 <= B]   # prefer >= 2 grid steps
    pool = multi if multi else cands
    at_or_below = [br for br in pool if br <= 256]
    return max(at_or_below) if at_or_below else min(pool)


def inst_inst_clr(anchor, pos, temperature=0.5, *, block_rows=None,
                  use_bf16=False, exp_bf16=None):
    B, D = anchor.shape
    assert pos.shape == (B, D)
    inv_temp = float(1.0 / float(temperature))

    block_rows = _pick_block_rows(B, block_rows)
    grid = (B // block_rows,)

    # pos is grid-invariant: normalize it ONCE here (f32 math) instead of
    # re-doing the rsqrt+sum on every grid step inside the kernel.
    p32 = pos.astype(jnp.float32)
    p_norm = p32 * jax.lax.rsqrt(
        jnp.maximum(jnp.sum(p32 * p32, axis=-1, keepdims=True), 1e-24))
    if use_bf16:
        p_norm = p_norm.astype(jnp.bfloat16)      # halves the resident VMEM / DMA

    # bf16 exp only on chips with a bf16 EUP (v6e / v7x) and only on the
    # loose-tolerance fast path.
    if exp_bf16 is None:
        kind = jax.devices()[0].device_kind.lower()
        exp_bf16 = use_bf16 and any(t in kind for t in ("v6", "v7", "7x"))

    # Generation-aware VMEM headroom (falls back to a safe 32 MiB cap).
    try:
        vmem_limit = int(pltpu.get_tpu_info().vmem_capacity_bytes * 0.8)
    except Exception:
        vmem_limit = 32 * 1024 * 1024

    kernel = functools.partial(_inst_inst_clr_kernel,
                               inv_temp=inv_temp, exp_bf16=exp_bf16)

    out = pl.pallas_call(
        kernel,
        out_shape=jax.ShapeDtypeStruct((B, 1), jnp.float32),
        grid_spec=pltpu.PrefetchScalarGridSpec(
            num_scalar_prefetch=0,
            grid=grid,
            in_specs=[
                # anchor row tile, native dtype, pipelined over the grid
                pl.BlockSpec((block_rows, D), lambda i: (i, 0)),
                # pre-normalized pos: fully resident, single-buffered VMEM
                pl.BlockSpec(memory_space=pltpu.MemorySpace.VMEM),
            ],
            out_specs=pl.BlockSpec((block_rows, 1), lambda i: (i, 0)),
        ),
        compiler_params=pltpu.CompilerParams(
            dimension_semantics=("parallel",),
            vmem_limit_bytes=vmem_limit),
    )(anchor, p_norm)
    return out[:, 0]


def reference_np(anchor, pos, temperature):
    """Pure numpy replica of the PyTorch forward (for verification)."""
    anchor = np.asarray(anchor, np.float32)
    pos = np.asarray(pos, np.float32)
    B = anchor.shape[0]
    a = anchor / np.maximum(np.linalg.norm(anchor, axis=1, keepdims=True), 1e-12)
    p = pos / np.maximum(np.linalg.norm(pos, axis=1, keepdims=True), 1e-12)
    sim = a @ p.T
    eye = np.eye(B, dtype=bool)
    positives = sim[eye].reshape(B, 1)
    negatives = sim[~eye].reshape(B, B - 1)
    logits = np.concatenate([positives, negatives], axis=1) / temperature
    m = logits.max(axis=1, keepdims=True)
    lse = (m + np.log(np.exp(logits - m).sum(axis=1, keepdims=True)))[:, 0]
    return lse - logits[:, 0]


if __name__ == "__main__":
    key = jax.random.PRNGKey(0)
    k1, k2, k3, k4, k5, k6 = jax.random.split(key, 6)

    # --- small shape (single grid step, full-array blocks) -------------------
    B, D = 8, 32
    anchor = jax.random.normal(k1, (B, D), jnp.float32)
    pos = jax.random.normal(k2, (B, D), jnp.float32)
    loss = jax.block_until_ready(inst_inst_clr(anchor, pos, temperature=0.5))
    ref = reference_np(anchor, pos, 0.5)
    np.testing.assert_allclose(np.asarray(loss), ref, rtol=1e-4, atol=1e-5)

    # --- larger shape: auto heuristic -> 128-row tiles, 2 parallel grid steps -
    B2, D2 = 256, 64
    anchor2 = jax.random.normal(k3, (B2, D2), jnp.float32)
    pos2 = jax.random.normal(k4, (B2, D2), jnp.float32)
    loss2 = jax.block_until_ready(inst_inst_clr(anchor2, pos2, temperature=0.5))
    ref2 = reference_np(anchor2, pos2, 0.5)
    np.testing.assert_allclose(np.asarray(loss2), ref2, rtol=1e-4, atol=1e-4)

    # --- irregular batch size exercising the fallback tile picker ------------
    B3, D3 = 12, 32
    anchor3 = jax.random.normal(k5, (B3, D3), jnp.float32)
    pos3 = jax.random.normal(k6, (B3, D3), jnp.float32)
    loss3 = jax.block_until_ready(inst_inst_clr(anchor3, pos3, temperature=0.2))
    ref3 = reference_np(anchor3, pos3, 0.2)
    np.testing.assert_allclose(np.asarray(loss3), ref3, rtol=1e-4, atol=1e-4)

    # --- bf16 fast path: native bf16 inputs, bf16 MXU (+ bf16 exp on v6e/v7x) -
    anchor_bf = anchor2.astype(jnp.bfloat16)
    pos_bf = pos2.astype(jnp.bfloat16)
    loss_bf = jax.block_until_ready(
        inst_inst_clr(anchor_bf, pos_bf, temperature=0.5, use_bf16=True))
    ref_bf = reference_np(np.asarray(anchor_bf, np.float32),
                          np.asarray(pos_bf, np.float32), 0.5)
    np.testing.assert_allclose(np.asarray(loss_bf), ref_bf, rtol=5e-2, atol=5e-2)

    print("KERNEL_OK")
</pallas_src>

<mosaic_0001>
module attributes {stable_mosaic.version = 11 : i64} {
  func.func @_inst_inst_clr_kernel(%arg0: i32, %arg1: memref<8x32xf32, #tpu.memory_space<vmem>>, %arg2: memref<8x32xf32, #tpu.memory_space<vmem>>, %arg3: memref<8x1xf32, #tpu.memory_space<vmem>>) attributes {dimension_semantics = [#tpu.dimension_semantics<parallel>], iteration_bounds = array<i64: 1>, scalar_prefetch = 0 : i64, scratch_operands = 0 : i64, tpu.core_type = #tpu.core_type<tc>, window_params = [{transform_indices = @transform_0, window_bounds = array<i64: 8, 32>}, {pipeline_mode = #tpu.pipeline_mode<synchronous>, transform_indices = @transform_1, window_bounds = array<i64: 8, 32>}, {transform_indices = @transform_2, window_bounds = array<i64: 8, 1>}]} {
    %c0 = arith.constant 0 : index
    %c0_0 = arith.constant 0 : index
    %0 = vector.load %arg1[%c0, %c0_0] : memref<8x32xf32, #tpu.memory_space<vmem>>, vector<8x32xf32>
    %1 = arith.mulf %0, %0 : vector<8x32xf32>
    %cst = arith.constant dense<0.000000e+00> : vector<8xf32>
    %2 = vector.multi_reduction <add>, %1, %cst [1] : vector<8x32xf32> to vector<8xf32>
    %3 = vector.shape_cast %2 : vector<8xf32> to vector<8x1xf32>
    %cst_1 = arith.constant 1.000000e-24 : f32
    %4 = vector.broadcast %cst_1 : f32 to vector<8x1xf32>
    %5 = arith.maximumf %3, %4 : vector<8x1xf32>
    %6 = math.rsqrt %5 : vector<8x1xf32>
    %cst_2 = arith.constant 2.000000e+00 : f32
    %7 = vector.broadcast %cst_2 : f32 to vector<8x1xf32>
    %8 = arith.mulf %6, %7 : vector<8x1xf32>
    %9 = vector.broadcast %8 : vector<8x1xf32> to vector<8x32xf32>
    %10 = arith.mulf %0, %9 : vector<8x32xf32>
    %c0_3 = arith.constant 0 : index
    %c0_4 = arith.constant 0 : index
    %11 = vector.load %arg2[%c0_3, %c0_4] : memref<8x32xf32, #tpu.memory_space<vmem>>, vector<8x32xf32>
    %cst_5 = arith.constant dense<0.000000e+00> : vector<8x8xf32>
    %12 = tpu.matmul %10, %11, %cst_5 {dimension_numbers = #tpu.dot_dimension_numbers<[1], [1], [0], [0], [0, 0, 1, 0], [], []>} : vector<8x32xf32>, vector<8x32xf32>, vector<8x8xf32> -> vector<8x8xf32>
    %c8_i32 = arith.constant 8 : i32
    %13 = arith.muli %arg0, %c8_i32 : i32
    %14 = tpu.assume_multiple %13, 8 : i32
    %15 = arith.index_cast %14 : i32 to index
    %c0_6 = arith.constant 0 : index
    %16 = vector.load %arg2[%15, %c0_6] : memref<8x32xf32, #tpu.memory_space<vmem>>, vector<8x32xf32>
    %17 = arith.mulf %10, %16 : vector<8x32xf32>
    %cst_7 = arith.constant dense<0.000000e+00> : vector<8xf32>
    %18 = vector.multi_reduction <add>, %17, %cst_7 [1] : vector<8x32xf32> to vector<8xf32>
    %19 = vector.shape_cast %18 : vector<8xf32> to vector<8x1xf32>
    %cst_8 = arith.constant dense<0xFF800000> : vector<8xf32>
    %20 = vector.multi_reduction <maximumf>, %12, %cst_8 [1] : vector<8x8xf32> to vector<8xf32>
    %21 = vector.shape_cast %20 : vector<8xf32> to vector<8x1xf32>
    %22 = vector.broadcast %21 : vector<8x1xf32> to vector<8x8xf32>
    %23 = arith.subf %12, %22 : vector<8x8xf32>
    %24 = math.exp %23 : vector<8x8xf32>
    %cst_9 = arith.constant dense<0.000000e+00> : vector<8xf32>
    %25 = vector.multi_reduction <add>, %24, %cst_9 [1] : vector<8x8xf32> to vector<8xf32>
    %26 = vector.shape_cast %25 : vector<8xf32> to vector<8x1xf32>
    %27 = math.log %26 : vector<8x1xf32>
    %28 = arith.addf %21, %27 : vector<8x1xf32>
    %29 = arith.subf %28, %19 : vector<8x1xf32>
    %c0_10 = arith.constant 0 : index
    %c0_11 = arith.constant 0 : index
    %30 = vector.load %arg3[%c0_10, %c0_11] : memref<8x1xf32, #tpu.memory_space<vmem>>, vector<8x1xf32>
    tpu.vector_store %arg3[%c0_10, %c0_11], %29 {strides = array<i32>} : memref<8x1xf32, #tpu.memory_space<vmem>>, vector<8x1xf32>,
    return
  }
  func.func @transform_0(%arg0: i32) -> (i32, i32) {
    %c0_i32 = arith.constant 0 : i32
    %c0_i32_0 = arith.constant 0 : i32
    return %arg0, %c0_i32 : i32, i32
  }
  func.func @transform_1(%arg0: i32) -> (i32, i32) {
    %c0_i32 = arith.constant 0 : i32
    %c0_i32_0 = arith.constant 0 : i32
    %c0_i32_1 = arith.constant 0 : i32
    return %c0_i32, %c0_i32_0 : i32, i32
  }
  func.func @transform_2(%arg0: i32) -> (i32, i32) {
    %c0_i32 = arith.constant 0 : i32
    %c0_i32_0 = arith.constant 0 : i32
    return %arg0, %c0_i32 : i32, i32
  }
}

</mosaic_0001>

<bundles_post_ra>
// kernel: tpu_custom_call.1
= control target key start
LH: loop header
LB: loop body
LE: loop exit
PB: predicated region body
PF: predicated region fallthrough
CT: control target
= control target key end

     0   :  { %7 = vsyncpa [#allocation3], 0  ;;  %s268_s0 = inlined_call_operand.hbm [shape: f32[8,32], index: 0, kind: input, shape index: {}]   ;;  %s269_s1 = inlined_call_operand.hbm [shape: f32[8,32], index: 1, kind: input, shape index: {}]   ;;  %s270_s2 = inlined_call_operand.vmem [shape: f32[8,1], index: 2, kind: output, shape index: {}]  }
   0x1   :  { %8 = vsyncpa [#allocation5], 0  ;;  %s218_s9 = smov [#allocation2]   ;;  %s219_s11 = smov [#allocation4]  }
   0x2   :  { %s15_s10 = sshll.u32 %s218_s9, 4  ;;  %s25_s12 = sshll.u32 %s219_s11, 4  ;;  %s16_s10 = int_to_ptr.vmem [resolvable:$true] %s15_s10  ;;  %s26_s12 = int_to_ptr.vmem [resolvable:$true] %s25_s12 }
   0x3   :  { %s170_s15 = scalar_lea.hbm %s268_s0, 128 }
   0x4   :  { %p171_p0 = scmp.ne.s32.totalorder %s268_s0, %s170_s15  ;;  %p174_p1 = scmp.lt.u32.totalorder %s170_s15, %s268_s0 }
   0x6   :  { %p176_p2 = pnand %p174_p1, %p171_p0 }
   0x8   :  { %179 = shalt.err (!%p176_p2)
}
   0x9   :  { %s180_s20 = scalar_lea.vmem %s16_s10, 128  ;;  %p185_p4 = scmp.lt.s32.totalorder %s16_s10, %s16_s10 }
   0xa   :  { %p181_p3 = scmp.ne.s32.totalorder %s16_s10, %s180_s20  ;;  %p186_p5 = scmp.lt.s32.totalorder %s180_s20, %s180_s20 }
   0xc   :  { %p187_p6 = por %p186_p5, %p185_p4 }
   0xe   :  { %p188_p7 = pnand %p187_p6, %p181_p3 }
  0x10   :  { %191 = shalt.err (!%p188_p7)
}
  0x11   :  { %18 = dma.hbm_to_vmem [thread:$0]  %s268_s0, 128, %s16_s10, [#allocation3]  }
  0x12   :  { %s192_s25 = scalar_lea.hbm %s269_s1, 128 }
  0x13   :  { %p193_p8 = scmp.ne.s32.totalorder %s269_s1, %s192_s25  ;;  %p196_p9 = scmp.lt.u32.totalorder %s192_s25, %s269_s1 }
  0x15   :  { %p198_p10 = pnand %p196_p9, %p193_p8 }
  0x17   :  { %201 = shalt.err (!%p198_p10)
}
  0x18   :  { %s202_s30 = scalar_lea.vmem %s26_s12, 128  ;;  %p207_p12 = scmp.lt.s32.totalorder %s26_s12, %s26_s12 }
  0x19   :  { %p203_p11 = scmp.ne.s32.totalorder %s26_s12, %s202_s30  ;;  %p208_p13 = scmp.lt.s32.totalorder %s202_s30, %s202_s30 }
  0x1b   :  { %p209_p0 = por %p208_p13, %p207_p12 }
  0x1d   :  { %p210_p1 = pnand %p209_p0, %p203_p11 }
  0x1f   :  { %213 = shalt.err (!%p210_p1)
}
  0x20   :  { %28 = dma.hbm_to_vmem [thread:$0]  %s269_s1, 128, %s26_s12, [#allocation5]  }
  0x21   :  { %214 = dma.done.wait [#allocation3], 128  }
  0x22   :  { %215 = vsyncadd [#allocation3], 4294967168 }
  0x23   :  { %216 = dma.done.wait [#allocation5], 128  }
  0x24   :  { %217 = vsyncadd [#allocation5], 4294967168  ;;  %v35_v0 = vld [vmem:[#allocation2] sm:$0xff]  ;;  %vm37_vm0 = vcmask 261120   ;;  %v220_v3 = vmov 0.0   ;;  %v45_v4 = vld [vmem:[#allocation4] sm:$0xff] }
  0x25   :  { %v36_v1 = vmul.f32 %v35_v0, %v35_v0  ;;  %155 = vmatprep.subr.mxu0 %v220_v3  ;;  %vm221_vm1 = vmmov 0   ;;  %vm129_vm2 = vcmask 64512   ;;  %vm143_vm3 = vcmask 7168  }
  0x26   :  { %156 = vmatpush3.xpose.msk.msra.mxu0 %vm37_vm0, %v45_v4  ;;  %157 = vmatprep.mubr.msk.f32.mxu0 %vm221_vm1, %v220_v3 }
  0x27   :  { %v38_v2 = vsel %vm37_vm0, %v36_v1, 0.0 }
  0x28   :  { %39 = vadd.xlane.f32.xlu0 %v38_v2 }
  0xb5   :  { %v40_v5 = vpop.xlane.xlu0 %39 }
  0xb6   :  { %v41_v6 = vmax.f32 %v40_v5, 1e-24 }
  0xb8   :  { %164 = vrsqrt.f32 %v41_v6 }
  0xc2   :  { %v165_v7 = vpop.eup %164 }
  0xc3   :  { %v43_v8 = vmul.f32 2.0, %v165_v7 }
  0xc5   :  { %v44_v9 = vmul.f32 %v43_v8, %v35_v0 }
  0xc7   :  { %158 = vmatmul.mubr.msk.f32.vlgmr.msra.gmra.mrb[0].mxu0 %vm37_vm0, %v44_v9  ;;  %v125_v18 = vmul.f32 %v45_v4, %v44_v9 }
  0xc9   :  { %v126_v19 = vsel %vm37_vm0, %v125_v18, 0.0 }
 0x19a   :  { %v118_v10 = vpop.f32.mrb[0].mxu0 }
 0x19b   :  { %v159_v11 = vpop.f32.mrb[1].mxu0  ;;  %v130_v12 = vsel %vm129_vm2, %v118_v10, -inf }
 0x19c   :  { %131 = vmax.xlane.f32.xlu0 %v130_v12 }
 0x229   :  { %v132_v13 = vpop.xlane.xlu0 %131 }
 0x22a   :  { %v133_v14 = vsub.f32 %v118_v10, %v132_v13 }
 0x22c   :  { %v134_v15 = vmul.f32 1.442695, %v133_v14 }
 0x22e   :  { %166 = vpow2.f32 %v134_v15 }
 0x238   :  { %v167_v16 = vpop.eup %166 }
 0x239   :  { %v136_v17 = vsel %vm129_vm2, %v167_v16, 0.0 }
 0x23a   :  { %137 = vadd.xlane.f32.xlu1 %v136_v17 }
 0x23e   :  { %127 = vadd.xlane.f32.xlu1 %v126_v19 }
 0x2c7   :  { %v138_v20 = vpop.xlane.xlu1 %137 }
 0x2c8   :  { %168 = vlog2.f32 %v138_v20 }
 0x2cb   :  { %v128_v24 = vpop.xlane.xlu1 %127 }
 0x2d2   :  { %v169_v21 = vpop.eup %168 }
 0x2d3   :  { %v140_v22 = vmul.f32 0.6931472, %v169_v21 }
 0x2d5   :  { %v141_v23 = vadd.f32 %v140_v22, %v132_v13 }
 0x2d7   :  { %v142_v25 = vsub.f32 %v141_v23, %v128_v24 }
 0x2d9   :  { %144 = vst.msk [vmem:[%s270_s2] sm:$0xff] %vm143_vm3, %v142_v25 }
 0x2da   :  { %149 = vsyncpa [#allocation3], 1 }
 0x2db   :  { %150 = vsyncpa [#allocation5], 1 }

</bundles_post_ra>
